<compile_context>
chip_gen: v5e
topology: v5e:2x2
jax: 0.10.0
libtpu: 0.0.40
codegen_flags: <defaults>
</compile_context>

<pallas_src>
import jax
import jax.numpy as jnp
from jax.experimental import pallas as pl
from jax.experimental.pallas import tpu as pltpu

LN_EPS = 1e-5  # PyTorch nn.LayerNorm default


# --------------------------------------------------------------------------
# Kernels
# --------------------------------------------------------------------------
def conformer_ffn_resident_kernel(x_ref, gamma_ref, beta_ref,
                                  w1_ref, b1_ref, w2_ref, b2_ref, o_ref):
    # x_ref: (tm, D) native dtype; w1_ref: (D, H) bf16; w2_ref: (H, D) bf16.
    x = x_ref[...].astype(jnp.float32)

    # LayerNorm over the feature axis (f32).
    mean = jnp.mean(x, axis=-1, keepdims=True)
    centered = x - mean
    var = jnp.mean(centered * centered, axis=-1, keepdims=True)
    xn = centered * jax.lax.rsqrt(var + LN_EPS)
    xn = xn * gamma_ref[...] + beta_ref[...]

    # Linear 1 (D -> H): bf16 MXU inputs, f32 accumulation; fused bias + SiLU,
    # then a single bf16 copy for the second matmul.
    h = jnp.dot(xn.astype(jnp.bfloat16), w1_ref[...],
                preferred_element_type=jnp.float32) + b1_ref[...]
    h = (h * jax.nn.sigmoid(h)).astype(jnp.bfloat16)

    # (dropout_1: identity in eval mode)

    # Linear 2 (H -> D).
    y = jnp.dot(h, w2_ref[...], preferred_element_type=jnp.float32) + b2_ref[...]

    # (dropout_2: identity in eval mode)

    # Residual: skip + 0.5 * y
    o_ref[...] = (x + 0.5 * y).astype(o_ref.dtype)


def conformer_ffn_htiled_kernel(x_ref, gamma_ref, beta_ref,
                                w1_ref, b1_ref, w2_ref, b2_ref,
                                o_ref, acc_ref, xn_ref):
    # Grid = (row_blocks, H // th); h axis is innermost ("arbitrary").
    hk = pl.program_id(1)
    nh = pl.num_programs(1)

    @pl.when(hk == 0)
    def _():
        x = x_ref[...].astype(jnp.float32)
        mean = jnp.mean(x, axis=-1, keepdims=True)
        centered = x - mean
        var = jnp.mean(centered * centered, axis=-1, keepdims=True)
        xn = centered * jax.lax.rsqrt(var + LN_EPS)
        xn = xn * gamma_ref[...] + beta_ref[...]
        xn_ref[...] = xn.astype(jnp.bfloat16)
        acc_ref[...] = jnp.zeros_like(acc_ref)

    # Linear-1 chunk -> SiLU -> partial Linear-2, accumulated in f32.
    h = jnp.dot(xn_ref[...], w1_ref[...],
                preferred_element_type=jnp.float32) + b1_ref[...]
    h = (h * jax.nn.sigmoid(h)).astype(jnp.bfloat16)
    acc_ref[...] += jnp.dot(h, w2_ref[...], preferred_element_type=jnp.float32)

    @pl.when(hk == nh - 1)
    def _():
        y = acc_ref[...] + b2_ref[...]
        o_ref[...] = (x_ref[...].astype(jnp.float32) + 0.5 * y).astype(o_ref.dtype)


# --------------------------------------------------------------------------
# VMEM accounting / budgeting
# --------------------------------------------------------------------------
def _round_up(n, m):
    return ((n + m - 1) // m) * m


def _vmem_budget_bytes():
    """75% of this generation's physical VMEM; conservative fallback if the
    hardware query is unavailable (64 MiB is the smallest across v5e/v6e/v7x)."""
    try:
        cap = int(pltpu.get_tpu_info().vmem_capacity_bytes)
    except Exception:  # narrow hardware-query guard; never masks compile errors
        cap = 64 << 20
    return int(0.75 * cap)


def _resident_vmem_bytes(tm, D, H, x_isz, o_isz, weight_bufs):
    weights = weight_bufs * 2 * D * H * 2            # w1 + w2 bf16, per buffer count
    io = 2 * tm * D * x_isz + 2 * tm * D * o_isz     # double-buffered x / out tiles
    hidden = tm * H * (4 + 2)                        # h (f32) + single bf16 copy
    temps = tm * D * (4 + 4 + 2)                     # x f32, xn/y f32, xn bf16
    small = 2 * (3 * D + H) * 4                      # gamma, beta, b1, b2
    return weights + io + hidden + temps + small


def _htiled_vmem_bytes(tm, D, H, th, x_isz, o_isz):
    weights = 2 * 2 * D * th * 2                     # streamed w1/w2 chunks, double-buffered
    io = 2 * tm * D * x_isz + 2 * tm * D * o_isz
    scratch = tm * D * (4 + 2)                       # f32 accumulator + bf16 xn
    hidden = tm * th * (4 + 2)                       # h chunk f32 + bf16 copy
    temps = tm * D * (4 + 4)
    small = 2 * (3 * D + 2 * th) * 4
    return weights + io + scratch + hidden + temps + small


# --------------------------------------------------------------------------
# Wrapper
# --------------------------------------------------------------------------
def conformer_ffn(x, gamma, beta, w1, b1, w2, b2, *,
                  tm=None, th=None, force_h_tiled=False):
    """x: (B, T, D). gamma/beta: (D,). w1: (D, H), b1: (H,), w2: (H, D), b2: (D,).
    Weights are ideally pre-cast to bf16 (cast here only if needed)."""
    B, T, D = x.shape
    H = w1.shape[1]
    N = B * T
    out_dtype = x.dtype
    x_isz = x.dtype.itemsize
    o_isz = jnp.dtype(out_dtype).itemsize

    # ---- row tile (adaptive, >= 2 blocks for the v7x dual TensorCores) ----
    if tm is None:
        tm = 512 if D <= 1024 else 256
    tm_eff = _round_up(max(8, min(tm, N)), 8)
    while pl.cdiv(N, tm_eff) < 2 and tm_eff > 8:
        tm_eff = max(8, _round_up(tm_eff // 2, 8))
    n_rows = pl.cdiv(N, tm_eff)

    # ---- VMEM budget & path selection ----
    cap = _vmem_budget_bytes()
    headroom = 2 << 20  # Mosaic internal scratch / cast copies

    use_h_tiled = bool(force_h_tiled)
    if _resident_vmem_bytes(tm_eff, D, H, x_isz, o_isz, weight_bufs=1) + headroom > cap:
        use_h_tiled = True

    if use_h_tiled:
        if th is not None:
            assert H % th == 0 and th % 128 == 0, "th must divide H and be a multiple of 128"
        else:
            cands = [c for c in (4096, 2048, 1024, 512, 256, 128)
                     if c <= H and H % c == 0]
            if not cands:
                # H not a multiple of 128: H-tiling would read garbage hidden
                # columns; fall back to the resident path.
                use_h_tiled = False
            else:
                th = next((c for c in cands
                           if _htiled_vmem_bytes(tm_eff, D, H, c, x_isz, o_isz)
                           + headroom <= cap),
                          cands[-1])

    # ---- parameter prep (no HBM pass over x: native dtype, no pad) ----
    x2 = x.reshape(N, D)
    gamma2 = gamma.reshape(1, D).astype(jnp.float32)
    beta2 = beta.reshape(1, D).astype(jnp.float32)
    b1_2 = b1.reshape(1, H).astype(jnp.float32)
    b2_2 = b2.reshape(1, D).astype(jnp.float32)
    w1b = w1 if w1.dtype == jnp.bfloat16 else w1.astype(jnp.bfloat16)
    w2b = w2 if w2.dtype == jnp.bfloat16 else w2.astype(jnp.bfloat16)
    args = (x2, gamma2, beta2, w1b, b1_2, w2b, b2_2)

    cost = pl.CostEstimate(
        flops=int(4 * N * D * H),                     # two matmuls
        transcendentals=int(N * H),                   # sigmoid in SiLU
        bytes_accessed=int(N * D * (x_isz + o_isz) + 2 * D * H * 2 + (3 * D + H) * 4),
    )

    # ---------------- H-tiled (streamed-weight) path ----------------
    if use_h_tiled:
        need = _htiled_vmem_bytes(tm_eff, D, H, th, x_isz, o_isz) + headroom
        vmem_limit = int(min(cap, max(32 << 20, need)))
        out2 = pl.pallas_call(
            conformer_ffn_htiled_kernel,
            out_shape=jax.ShapeDtypeStruct((N, D), out_dtype),
            grid_spec=pltpu.PrefetchScalarGridSpec(
                num_scalar_prefetch=0,
                grid=(n_rows, H // th),
                in_specs=[
                    pl.BlockSpec((tm_eff, D), lambda i, k: (i, 0)),   # x (resident over h)
                    pl.BlockSpec((1, D), lambda i, k: (0, 0)),        # gamma
                    pl.BlockSpec((1, D), lambda i, k: (0, 0)),        # beta
                    pl.BlockSpec((D, th), lambda i, k: (0, k)),       # w1 chunk
                    pl.BlockSpec((1, th), lambda i, k: (0, k)),       # b1 chunk
                    pl.BlockSpec((th, D), lambda i, k: (k, 0)),       # w2 chunk
                    pl.BlockSpec((1, D), lambda i, k: (0, 0)),        # b2
                ],
                out_specs=pl.BlockSpec((tm_eff, D), lambda i, k: (i, 0)),
                scratch_shapes=[pltpu.VMEM((tm_eff, D), jnp.float32),    # linear_2 acc
                                pltpu.VMEM((tm_eff, D), jnp.bfloat16)],  # LN output
            ),
            compiler_params=pltpu.CompilerParams(
                dimension_semantics=("parallel", "arbitrary"),
                vmem_limit_bytes=vmem_limit),
            cost_estimate=cost,
        )(*args)
        return out2.reshape(B, T, D)

    # ---------------- resident-weight path ----------------
    def build(weight_pipeline_mode, weight_bufs):
        need = _resident_vmem_bytes(tm_eff, D, H, x_isz, o_isz, weight_bufs) + headroom
        vmem_limit = int(min(cap, max(32 << 20, need)))
        if weight_pipeline_mode is None:
            def wspec(shape, imap):
                return pl.BlockSpec(shape, imap)
        else:
            def wspec(shape, imap):
                return pl.BlockSpec(shape, imap, pipeline_mode=weight_pipeline_mode)
        return pl.pallas_call(
            conformer_ffn_resident_kernel,
            out_shape=jax.ShapeDtypeStruct((N, D), out_dtype),
            grid_spec=pltpu.PrefetchScalarGridSpec(
                num_scalar_prefetch=0,
                grid=(n_rows,),
                in_specs=[
                    pl.BlockSpec((tm_eff, D), lambda i: (i, 0)),   # x rows tile
                    pl.BlockSpec((1, D), lambda i: (0, 0)),        # gamma
                    pl.BlockSpec((1, D), lambda i: (0, 0)),        # beta
                    wspec((D, H), lambda i: (0, 0)),               # w1 (resident)
                    pl.BlockSpec((1, H), lambda i: (0, 0)),        # b1
                    wspec((H, D), lambda i: (0, 0)),               # w2 (resident)
                    pl.BlockSpec((1, D), lambda i: (0, 0)),        # b2
                ],
                out_specs=pl.BlockSpec((tm_eff, D), lambda i: (i, 0)),
            ),
            compiler_params=pltpu.CompilerParams(
                dimension_semantics=("parallel",),
                vmem_limit_bytes=vmem_limit),
            cost_estimate=cost,
        )

    try:
        # Constant-index weight blocks never change -> a single buffer suffices.
        out2 = build(pl.Buffered(1), 1)(*args)
    except (TypeError, ValueError, NotImplementedError, pltpu.LoweringException):
        # Single-buffer pipeline_mode unsupported on this JAX version: retry
        # with default (double) buffering and a matching VMEM budget.
        out2 = build(None, 2)(*args)
    return out2.reshape(B, T, D)


# --------------------------------------------------------------------------
# Reference & self-test
# --------------------------------------------------------------------------
def reference_ffn(x, gamma, beta, w1, b1, w2, b2):
    mean = jnp.mean(x, axis=-1, keepdims=True)
    var = jnp.mean((x - mean) ** 2, axis=-1, keepdims=True)
    xn = (x - mean) / jnp.sqrt(var + LN_EPS) * gamma + beta
    h = xn @ w1 + b1
    h = h * jax.nn.sigmoid(h)
    y = h @ w2 + b2
    return x + 0.5 * y


if __name__ == "__main__":
    # Small but lane-dense test shapes (D multiple of 128).
    B, T, D, EXP = 2, 8, 128, 4
    H = D * EXP

    key = jax.random.PRNGKey(0)
    kx, kg, kb, kw1, kb1, kw2, kb2 = jax.random.split(key, 7)

    x = jax.random.normal(kx, (B, T, D), dtype=jnp.float32)
    gamma = jnp.ones((D,), jnp.float32) + 0.1 * jax.random.normal(kg, (D,), jnp.float32)
    beta = 0.1 * jax.random.normal(kb, (D,), jnp.float32)
    # nn.Linear stores weight (out, in); the kernel uses the transposed (in, out) layout.
    w1 = jax.random.normal(kw1, (D, H), jnp.float32) / jnp.sqrt(D)
    b1 = 0.1 * jax.random.normal(kb1, (H,), jnp.float32)
    w2 = jax.random.normal(kw2, (H, D), jnp.float32) / jnp.sqrt(H)
    b2 = 0.1 * jax.random.normal(kb2, (D,), jnp.float32)

    # Pre-cast weights to bf16 once ("init time") so calls pay no per-call cast.
    w1b = w1.astype(jnp.bfloat16)
    w2b = w2.astype(jnp.bfloat16)

    ref = reference_ffn(x, gamma, beta, w1, b1, w2, b2)

    # Resident-weight path.
    out = jax.block_until_ready(conformer_ffn(x, gamma, beta, w1b, b1, w2b, b2))
    assert out.shape == (B, T, D)
    # bf16 MXU inputs with f32 accumulation -> loosen tolerance vs f32 reference.
    assert jnp.allclose(out, ref, atol=5e-2, rtol=5e-2), "resident path mismatch"

    # H-tiled (streamed-weights) path, forced at small shape for coverage.
    out_t = jax.block_until_ready(
        conformer_ffn(x, gamma, beta, w1b, b1, w2b, b2, force_h_tiled=True, th=256))
    assert out_t.shape == (B, T, D)
    assert jnp.allclose(out_t, ref, atol=5e-2, rtol=5e-2), "h-tiled path mismatch"

    print("KERNEL_OK")
</pallas_src>

<mosaic_0001>
module attributes {stable_mosaic.version = 11 : i64} {
  func.func @conformer_ffn_resident_kernel(%arg0: i32, %arg1: memref<8x128xf32, #tpu.memory_space<vmem>>, %arg2: memref<1x128xf32, #tpu.memory_space<vmem>>, %arg3: memref<1x128xf32, #tpu.memory_space<vmem>>, %arg4: memref<128x512xbf16, #tpu.memory_space<vmem>>, %arg5: memref<1x512xf32, #tpu.memory_space<vmem>>, %arg6: memref<512x128xbf16, #tpu.memory_space<vmem>>, %arg7: memref<1x128xf32, #tpu.memory_space<vmem>>, %arg8: memref<8x128xf32, #tpu.memory_space<vmem>>) attributes {dimension_semantics = [#tpu.dimension_semantics<parallel>], iteration_bounds = array<i64: 2>, scalar_prefetch = 0 : i64, scratch_operands = 0 : i64, tpu.core_type = #tpu.core_type<tc>, window_params = [{transform_indices = @transform_0, window_bounds = array<i64: 8, 128>}, {pipeline_mode = #tpu.pipeline_mode<synchronous>, transform_indices = @transform_1, window_bounds = array<i64: 1, 128>}, {pipeline_mode = #tpu.pipeline_mode<synchronous>, transform_indices = @transform_2, window_bounds = array<i64: 1, 128>}, {pipeline_mode = #tpu.pipeline_mode<synchronous>, transform_indices = @transform_3, window_bounds = array<i64: 128, 512>}, {pipeline_mode = #tpu.pipeline_mode<synchronous>, transform_indices = @transform_4, window_bounds = array<i64: 1, 512>}, {pipeline_mode = #tpu.pipeline_mode<synchronous>, transform_indices = @transform_5, window_bounds = array<i64: 512, 128>}, {pipeline_mode = #tpu.pipeline_mode<synchronous>, transform_indices = @transform_6, window_bounds = array<i64: 1, 128>}, {transform_indices = @transform_7, window_bounds = array<i64: 8, 128>}]} {
    %c0 = arith.constant 0 : index
    %c0_0 = arith.constant 0 : index
    %0 = vector.load %arg1[%c0, %c0_0] : memref<8x128xf32, #tpu.memory_space<vmem>>, vector<8x128xf32>
    %cst = arith.constant dense<0.000000e+00> : vector<8xf32>
    %1 = vector.multi_reduction <add>, %0, %cst [1] : vector<8x128xf32> to vector<8xf32>
    %2 = vector.shape_cast %1 : vector<8xf32> to vector<8x1xf32>
    %cst_1 = arith.constant 1.280000e+02 : f32
    %3 = vector.broadcast %cst_1 : f32 to vector<8x1xf32>
    %4 = arith.divf %2, %3 : vector<8x1xf32>
    %5 = vector.broadcast %4 : vector<8x1xf32> to vector<8x128xf32>
    %6 = arith.subf %0, %5 : vector<8x128xf32>
    %7 = arith.mulf %6, %6 : vector<8x128xf32>
    %cst_2 = arith.constant dense<0.000000e+00> : vector<8xf32>
    %8 = vector.multi_reduction <add>, %7, %cst_2 [1] : vector<8x128xf32> to vector<8xf32>
    %9 = vector.shape_cast %8 : vector<8xf32> to vector<8x1xf32>
    %cst_3 = arith.constant 1.280000e+02 : f32
    %10 = vector.broadcast %cst_3 : f32 to vector<8x1xf32>
    %11 = arith.divf %9, %10 : vector<8x1xf32>
    %cst_4 = arith.constant 9.99999974E-6 : f32
    %12 = vector.broadcast %cst_4 : f32 to vector<8x1xf32>
    %13 = arith.addf %11, %12 : vector<8x1xf32>
    %14 = math.rsqrt %13 : vector<8x1xf32>
    %15 = vector.broadcast %14 : vector<8x1xf32> to vector<8x128xf32>
    %16 = arith.mulf %6, %15 : vector<8x128xf32>
    %c0_5 = arith.constant 0 : index
    %c0_6 = arith.constant 0 : index
    %17 = vector.load %arg2[%c0_5, %c0_6] : memref<1x128xf32, #tpu.memory_space<vmem>>, vector<1x128xf32>
    %18 = vector.broadcast %17 : vector<1x128xf32> to vector<8x128xf32>
    %19 = arith.mulf %16, %18 : vector<8x128xf32>
    %c0_7 = arith.constant 0 : index
    %c0_8 = arith.constant 0 : index
    %20 = vector.load %arg3[%c0_7, %c0_8] : memref<1x128xf32, #tpu.memory_space<vmem>>, vector<1x128xf32>
    %21 = vector.broadcast %20 : vector<1x128xf32> to vector<8x128xf32>
    %22 = arith.addf %19, %21 : vector<8x128xf32>
    %23 = arith.truncf %22 : vector<8x128xf32> to vector<8x128xbf16>
    %c0_9 = arith.constant 0 : index
    %c0_10 = arith.constant 0 : index
    %24 = vector.load %arg4[%c0_9, %c0_10] : memref<128x512xbf16, #tpu.memory_space<vmem>>, vector<128x512xbf16>
    %cst_11 = arith.constant dense<0.000000e+00> : vector<8x512xf32>
    %25 = tpu.matmul %23, %24, %cst_11 {dimension_numbers = #tpu.dot_dimension_numbers<[1], [0], [0], [1], [0, 0, 1, 1], [], []>} : vector<8x128xbf16>, vector<128x512xbf16>, vector<8x512xf32> -> vector<8x512xf32>
    %c0_12 = arith.constant 0 : index
    %c0_13 = arith.constant 0 : index
    %26 = vector.load %arg5[%c0_12, %c0_13] : memref<1x512xf32, #tpu.memory_space<vmem>>, vector<1x512xf32>
    %27 = vector.broadcast %26 : vector<1x512xf32> to vector<8x512xf32>
    %28 = arith.addf %25, %27 : vector<8x512xf32>
    %29 = arith.negf %28 : vector<8x512xf32>
    %30 = math.exp %29 : vector<8x512xf32>
    %cst_14 = arith.constant 1.000000e+00 : f32
    %31 = vector.broadcast %cst_14 : f32 to vector<8x512xf32>
    %32 = arith.addf %31, %30 : vector<8x512xf32>
    %33 = arith.divf %31, %32 : vector<8x512xf32>
    %34 = arith.mulf %28, %33 : vector<8x512xf32>
    %35 = arith.truncf %34 : vector<8x512xf32> to vector<8x512xbf16>
    %c0_15 = arith.constant 0 : index
    %c0_16 = arith.constant 0 : index
    %36 = vector.load %arg6[%c0_15, %c0_16] : memref<512x128xbf16, #tpu.memory_space<vmem>>, vector<512x128xbf16>
    %cst_17 = arith.constant dense<0.000000e+00> : vector<8x128xf32>
    %37 = tpu.matmul %35, %36, %cst_17 {dimension_numbers = #tpu.dot_dimension_numbers<[1], [0], [0], [1], [0, 0, 1, 1], [], []>} : vector<8x512xbf16>, vector<512x128xbf16>, vector<8x128xf32> -> vector<8x128xf32>
    %c0_18 = arith.constant 0 : index
    %c0_19 = arith.constant 0 : index
    %38 = vector.load %arg7[%c0_18, %c0_19] : memref<1x128xf32, #tpu.memory_space<vmem>>, vector<1x128xf32>
    %39 = vector.broadcast %38 : vector<1x128xf32> to vector<8x128xf32>
    %40 = arith.addf %37, %39 : vector<8x128xf32>
    %cst_20 = arith.constant 5.000000e-01 : f32
    %41 = vector.broadcast %cst_20 : f32 to vector<8x128xf32>
    %42 = arith.mulf %41, %40 : vector<8x128xf32>
    %43 = arith.addf %0, %42 : vector<8x128xf32>
    %c0_21 = arith.constant 0 : index
    %c0_22 = arith.constant 0 : index
    %44 = vector.load %arg8[%c0_21, %c0_22] : memref<8x128xf32, #tpu.memory_space<vmem>>, vector<8x128xf32>
    tpu.vector_store %arg8[%c0_21, %c0_22], %43 {strides = array<i32>} : memref<8x128xf32, #tpu.memory_space<vmem>>, vector<8x128xf32>,
    return
  }
  func.func @transform_0(%arg0: i32) -> (i32, i32) {
    %c0_i32 = arith.constant 0 : i32
    %c0_i32_0 = arith.constant 0 : i32
    return %arg0, %c0_i32 : i32, i32
  }
  func.func @transform_1(%arg0: i32) -> (i32, i32) {
    %c0_i32 = arith.constant 0 : i32
    %c0_i32_0 = arith.constant 0 : i32
    %c0_i32_1 = arith.constant 0 : i32
    return %c0_i32, %c0_i32_0 : i32, i32
  }
  func.func @transform_2(%arg0: i32) -> (i32, i32) {
    %c0_i32 = arith.constant 0 : i32
    %c0_i32_0 = arith.constant 0 : i32
    %c0_i32_1 = arith.constant 0 : i32
    return %c0_i32, %c0_i32_0 : i32, i32
  }
  func.func @transform_3(%arg0: i32) -> (i32, i32) {
    %c0_i32 = arith.constant 0 : i32
    %c0_i32_0 = arith.constant 0 : i32
    %c0_i32_1 = arith.constant 0 : i32
    return %c0_i32, %c0_i32_0 : i32, i32
  }
  func.func @transform_4(%arg0: i32) -> (i32, i32) {
    %c0_i32 = arith.constant 0 : i32
    %c0_i32_0 = arith.constant 0 : i32
    %c0_i32_1 = arith.constant 0 : i32
    return %c0_i32, %c0_i32_0 : i32, i32
  }
  func.func @transform_5(%arg0: i32) -> (i32, i32) {
    %c0_i32 = arith.constant 0 : i32
    %c0_i32_0 = arith.constant 0 : i32
    %c0_i32_1 = arith.constant 0 : i32
    return %c0_i32, %c0_i32_0 : i32, i32
  }
  func.func @transform_6(%arg0: i32) -> (i32, i32) {
    %c0_i32 = arith.constant 0 : i32
    %c0_i32_0 = arith.constant 0 : i32
    %c0_i32_1 = arith.constant 0 : i32
    return %c0_i32, %c0_i32_0 : i32, i32
  }
  func.func @transform_7(%arg0: i32) -> (i32, i32) {
    %c0_i32 = arith.constant 0 : i32
    %c0_i32_0 = arith.constant 0 : i32
    return %arg0, %c0_i32 : i32, i32
  }
}

</mosaic_0001>

<bundles_post_ra>
// kernel: tpu_custom_call.1
= control target key start
LH: loop header
LB: loop body
LE: loop exit
PB: predicated region body
PF: predicated region fallthrough
CT: control target
= control target key end

     0   :  { %s2122_s0 = inlined_call_operand.hbm [shape: f32[16,128], index: 0, kind: input, shape index: {}]   ;;  %s2123_s1 = inlined_call_operand.hbm [shape: f32[1,128], index: 1, kind: input, shape index: {}]   ;;  %s2124_s2 = inlined_call_operand.vmem [shape: f32[1,128], index: 2, kind: input, shape index: {}]   ;;  %s2125_s3 = inlined_call_operand.hbm [shape: bf16[128,512], index: 3, kind: input, shape index: {}]   ;;  %s2126_s4 = inlined_call_operand.hbm [shape: f32[1,512], index: 4, kind: input, shape index: {}]   ;;  %s2127_s5 = inlined_call_operand.hbm [shape: bf16[512,128], index: 5, kind: input, shape index: {}]   ;;  %s2128_s6 = inlined_call_operand.vmem [shape: f32[1,128], index: 6, kind: input, shape index: {}]   ;;  %s2129_s7 = inlined_call_operand.hbm [shape: f32[16,128], index: 7, kind: output, shape index: {}]  }
   0x1   :  { %2130 = sst [smem:[#allocation16_spill]] %s2123_s1 }
   0x2   :  { %2131 = sst [smem:[#allocation17_spill]] %s2125_s3 }
   0x3   :  { %12 = vsyncpa [#allocation3], 0 }
   0x4   :  { %14 = vsyncpa [#allocation3 + $0x1], 0 }
   0x5   :  { %15 = vsyncpa [#allocation6], 0 }
   0x6   :  { %16 = vsyncpa [#allocation9], 0 }
   0x7   :  { %17 = vsyncpa [#allocation4], 0 }
   0x8   :  { %19 = vsyncpa [#allocation4 + $0x1], 0  ;;  %s1908_s24 = smov 0   ;;  %s1910_s25 = smov 0  }
   0x9   :  { %s1912_s26 = smov 0   ;;  %s1914_s27 = smov 0  }
   0xa LB: > { %s2132_s1 = sld [smem:[#allocation16_spill]]  ;;  %s1932_s8 = sadd.s32 4294967295, %s1857_s27   ;;  %s1857_s27 = sphi %s1914_s27, %s2145_s27   ;;  %s1853_s26 = sphi %s1912_s26, %s2144_s26   ;;  %s1849_s25 = sphi %s1910_s25, %s2143_s25   ;;  %s1845_s24 = sphi %s1908_s24, %s2142_s24  }
   0xb   : > { %p1175_p0 = scmp.ge.s32.totalorder %s1857_s27, 1  ;;  %p46_p1 = scmp.eq.s32.totalorder %s1932_s8, 0 }
   0xc   : > { %p208_p2 = scmp.lt.s32.totalorder %s1857_s27, 3  ;;  %s1859_s10 = smov [#allocation5]  }
   0xd   : > { %s222_s11 = sshll.u32 %s1859_s10, 4  ;;  %s249_s14 = sshll.u32 %s2126_s4, 4  ;;  %s223_s11 = int_to_ptr.vmem [resolvable:$true] %s222_s11  ;;  %s250_s14 = int_to_ptr.hbm [resolvable:$true] %s249_s14 }
   0xe   : > { %p1937_p3 = pnand %p1175_p0, %p208_p2  ;;  %s1860_s16 = smov [#allocation8]  }
   0xf   : > { %s251_s17 = sshll.u32 %s1860_s16, 4  ;;  %s2135_s3 = sld [smem:[#allocation17_spill]]  ;;  %s252_s17 = int_to_ptr.vmem [resolvable:$true] %s251_s17 }
  0x10   : > { %s220_s30 = sshll.u32 %s2132_s1, 4  ;;  %p1538_p5 = pneg %p1937_p3  ;;  %s221_s30 = int_to_ptr.hbm [resolvable:$true] %s220_s30 }
  0x11   : > { %s1861_s21 = smov [#allocation7]   ;;  %s260_s29 = sshll.u32 %s2127_s5, 4  ;;  %s261_s29 = int_to_ptr.hbm [resolvable:$true] %s260_s29 }
  0x12   : > { %p1949_p6 = pnand %p1538_p5, %p46_p1  ;;  %s236_s22 = sshll.u32 %s1861_s21, 4  ;;  %s237_s22 = int_to_ptr.vmem [resolvable:$true] %s236_s22 }
  0x13   : > { %s1862_s10 = smov 256   ;;  %s1863_s12 = smov 16  }
  0x14   : > { %1541 = dma.hbm_to_vmem [thread:$0]  (!%p1949_p6), %s221_s30, 16, %s223_s11, [#allocation6]  }
  0x15   : > { %s234_s20 = sshll.u32 %s2135_s3, 4  ;;  %s1864_s30 = smov [#allocation10]   ;;  %s235_s20 = int_to_ptr.hbm [resolvable:$true] %s234_s20 }
  0x16   : > { %1547 = dma.hbm_to_vmem [thread:$0]  (!%p1949_p6), %s250_s14, 64, %s252_s17, [#allocation9]  }
  0x17   : > { %1544 = dma.hbm_to_vmem [thread:$0]  (!%p1949_p6), %s235_s20, 4096, %s237_s22, [#allocation6], %s1862_s10, %s1862_s10, %s1863_s12  }
  0x18   : > { %s262_s11 = sshll.u32 %s1864_s30, 4  ;;  %s1865_s13 = smov 64   ;;  %s263_s11 = int_to_ptr.vmem [resolvable:$true] %s262_s11 }
  0x19   : > { %s1866_s14 = smov 4   ;;  %s1174_s16 = sadd.s32 4294967294, %s1857_s27  }
  0x1a   : > { %1550 = dma.hbm_to_vmem [thread:$0]  (!%p1949_p6), %s261_s29, 4096, %s263_s11, [#allocation9], %s1865_s13, %s1865_s13, %s1866_s14  }
  0x1b   : > { %s1969_s17 = sadd.s32 1, %s1857_s27   ;;  %s32_s19 = sadd.s32 1, %s1853_s26 }
  0x1c   : > { %s29_s18 = ssub.s32 %s1857_s27, %s1969_s17  ;;  %p39_p8 = scmp.ne.s32.totalorder %s1853_s26, %s1849_s25 }
  0x1d   : > { %p30_p7 = scmp.eq.s32.totalorder %s29_s18, 0  ;;  %p40_p9 = scmp.eq.s32.totalorder %s1857_s27, 0 }
  0x1e   : > { %p45_p10 = scmp.ne.s32.totalorder %s1849_s25, %s1845_s24  ;;  %p195_p13 = scmp.eq.s32.totalorder %s1932_s8, 1 }
  0x1f   : > { %s1980_s20 = scalar_select %p30_p7, %s1853_s26, %s32_s19  }
  0x20   : > { %p1982_p11 = por %p40_p9, %p39_p8  ;;  %p1988_p12 = por %p46_p1, %p45_p10 }
  0x21   : > { %p201_p0 = scmp.eq.s32.totalorder %s1174_s16, 1  ;;  %p1563_p2 = scmp.lt.s32.totalorder %s1857_s27, 2 }
  0x22   : > { %s279_s22 = sand.u32 1, %s1853_s26   ;;  %p1995_p5 = por %p195_p13, %p39_p8 }
  0x23   : > { %p1999_p6 = por %p201_p0, %p45_p10  ;;  %s1181_s29 = sshll.u32 %s279_s22, 3 }
  0x24   : > { %s1182_s10 = sshll.u32 %s1857_s27, 3  ;;  %s283_s13 = scalar_lea.vmem [#allocation2], %s1181_s29 }
  0x25   : > { %s287_s11 = scalar_lea.hbm %s2122_s0, %s1182_s10  ;;  %s291_s14 = sshll.u32 %s283_s13, 4  ;;  %s292_s14 = int_to_ptr.vmem [resolvable:$true] %s291_s14 }
  0x26   : > { %s289_s18 = sshll.u32 %s287_s11, 4  ;;  %p2009_p7 = pnand %p1563_p2, %p1982_p11  ;;  %s290_s18 = int_to_ptr.hbm [resolvable:$true] %s289_s18 }
  0x27   : > { %s280_s19 = scalar_lea.sflag [#allocation3], %s279_s22  ;;  %s1753_s1 = sshra.s32 %s290_s18, 4  ;;  %s1754_s1 = int_to_ptr.hbm [resolvable:$true] %s1753_s1 }
  0x28   : > { %s1755_s3 = scalar_lea.hbm %s1754_s1, 8  ;;  %p1757_p9 = pneg %p2009_p7 }
  0x29   : > { %p1756_p8 = scmp.ne.s32.totalorder %s1754_s1, %s1755_s3  ;;  %s1760_s12 = scalar_lea.hbm %s2122_s0, 16 }
  0x2a   : > { %p1761_p11 = scmp.lt.s32.totalorder %s1754_s1, %s2122_s0  ;;  %p1762_p0 = scmp.lt.s32.totalorder %s1760_s12, %s1755_s3 }
  0x2b   : > { %p1758_p10 = pnand %p1757_p9, %p1756_p8 }
  0x2c   : > { %p1763_p2 = por %p1762_p0, %p1761_p11 }
  0x2d   : > { %p1759_p13 = pneg %p1758_p10 }
  0x2f   : > { %p1764_p4 = pnand %p1763_p2, %p1759_p13 }
  0x31   : > { %1767 = shalt.err (!%p1764_p4)
}
  0x32   : > { %1554 = dma.hbm_to_vmem [thread:$0]  (!%p2009_p7), %s290_s18, 128, %s292_s14, %s280_s19  }
  0x33   : > { %300 = sbr.rel (%p1937_p3) target bundleno = 640 (0x280), region = 48  ;;  %s2026_s22 = sand.u32 (!%p1937_p3), 1, %s1849_s25  }
  0x34   : > { %s1184_s11 = sshll.u32 (!%p1937_p3), %s2026_s22, 3  ;;  %s303_s13 = scalar_lea.sflag (!%p1937_p3), [#allocation3], %s2026_s22 }
  0x35   : > { %s306_s1 = scalar_lea.vmem (!%p1937_p3), [#allocation2], %s1184_s11 }
  0x38   : > { %1828 = dma.done.wait (%p1988_p12), %s303_s13, 128  }
  0x39   : > { %1830 = vsyncadd (%p1988_p12), %s303_s13, 4294967168 }
  0x3a   : > { %1832 = dma.done.wait (%p46_p1), [#allocation6], 4112  }
  0x3b   : > { %1834 = vsyncadd (%p46_p1), [#allocation6], 4294963184 }
  0x3c   : > { %1836 = dma.done.wait (%p46_p1), [#allocation9], 4160  }
  0x3d   : > { %1838 = vsyncadd (%p46_p1), [#allocation9], 4294963136  ;;  %v2044_v0 = vld [vmem:[%s306_s1] sm:$0xff]  ;;  %v1867_v1 = vmov 128.0   ;;  %v1304_v2 = vld [vmem:[#allocation7 + $0xe0] sm:$0xf] }
  0x3e   : > { %359 = vadd.xlane.f32.xlu0 %v2044_v0  ;;  %1613 = vrcp.f32 %v1867_v1  ;;  %v1484_v3 = vld [vmem:[#allocation7 + $0xec] sm:$0xf0]  ;;  %v1482_v4 = vld [vmem:[#allocation7 + $0xe4] sm:$0xf]  ;;  %v1306_v6 = vld [vmem:[#allocation7 + $0xf0] sm:$0xf0] }
  0x3f   : > { %v1305_v5 = vor.u32 %v1484_v3, %v1304_v2  ;;  %v1312_v7 = vld [vmem:[#allocation7 + $0xe8] sm:$0xf]  ;;  %v1485_v8 = vld [vmem:[#allocation7 + $0xf4] sm:$0xf0]  ;;  %v1309_v9 = vor.u32 %v1482_v4, %v1306_v6  ;;  %v1483_v11 = vld [vmem:[#allocation7 + $0xec] sm:$0xf] }
  0x40   : > { %v1313_v10 = vor.u32 %v1485_v8, %v1312_v7  ;;  %v1314_v12 = vld [vmem:[#allocation7 + $0xf8] sm:$0xf0]  ;;  %v1288_v24 = vld [vmem:[#allocation7 + $0xc0] sm:$0xf]  ;;  %v1480_v25 = vld [vmem:[#allocation7 + $0xcc] sm:$0xf0] }
  0x41   : > { %599 = vmatpush.bf16.msra.mxu0 %v1305_v5  ;;  %v1317_v13 = vor.u32 %v1483_v11, %v1314_v12  ;;  %612 = vmatpush.bf16.msra.mxu1 %v1309_v9  ;;  %v1478_v26 = vld [vmem:[#allocation7 + $0xc4] sm:$0xf]  ;;  %v1289_v27 = vor.u32 %v1480_v25, %v1288_v24  ;;  %v1290_v28 = vld [vmem:[#allocation7 + $0xd0] sm:$0xf0]  ;;  %v1296_v29 = vld [vmem:[#allocation7 + $0xc8] sm:$0xf] }
  0x42   : > { %625 = vmatpush.bf16.msra.mxu2 %v1313_v10  ;;  %v1481_v30 = vld [vmem:[#allocation7 + $0xd4] sm:$0xf0]  ;;  %v1293_v31 = vor.u32 %v1478_v26, %v1290_v28  ;;  %v1479_v33 = vld [vmem:[#allocation7 + $0xcc] sm:$0xf]  ;;  %v1298_v34 = vld [vmem:[#allocation7 + $0xd8] sm:$0xf0] }
  0x43   : > { %638 = vmatpush.bf16.msra.mxu3 %v1317_v13  ;;  %v1297_v32 = vor.u32 %v1481_v30, %v1296_v29  ;;  %v1301_v35 = vor.u32 %v1479_v33, %v1298_v34  ;;  %v1272_v36 = vld [vmem:[#allocation7 + $0xa0] sm:$0xf]  ;;  %v1476_v37 = vld [vmem:[#allocation7 + $0xac] sm:$0xf0]  ;;  %v1474_v38 = vld [vmem:[#allocation7 + $0xa4] sm:$0xf] }
  0x44   : > { %v1614_v14 = vpop.eup %1613  ;;  %v1273_v39 = vor.u32 %v1476_v37, %v1272_v36  ;;  %v1274_v40 = vld [vmem:[#allocation7 + $0xb0] sm:$0xf0]  ;;  %v1280_v41 = vld [vmem:[#allocation7 + $0xa8] sm:$0xf]  ;;  %v1477_v42 = vld [vmem:[#allocation7 + $0xb4] sm:$0xf0] }
  0x45   : > { %v362_v15 = vmul.f32 128.0, %v1614_v14  ;;  %vm366_vm0 = vweird.f32 %v1614_v14  ;;  %600 = vmatpush.bf16.msra.mxu0 %v1289_v27  ;;  %613 = vmatpush.bf16.msra.mxu1 %v1293_v31  ;;  %v1277_v43 = vor.u32 %v1474_v38, %v1274_v40  ;;  %v1281_v44 = vor.u32 %v1477_v42, %v1280_v41  ;;  %v1475_v45 = vld [vmem:[#allocation7 + $0xac] sm:$0xf]  ;;  %v1282_v46 = vld [vmem:[#allocation7 + $0xb8] sm:$0xf0]  ;;  %s1451_s18 = sshll.u32 %s1932_s8, 3 }
  0x46   : > { %626 = vmatpush.bf16.msra.mxu2 %v1297_v32  ;;  %v1285_v47 = vor.u32 %v1475_v45, %v1282_v46  ;;  %v1256_v48 = vld [vmem:[#allocation7 + $0x80] sm:$0xf]  ;;  %v1472_v49 = vld [vmem:[#allocation7 + $0x8c] sm:$0xf0]  ;;  %v1470_v50 = vld [vmem:[#allocation7 + $0x84] sm:$0xf]  ;;  %s1061_s29 = scalar_lea.hbm %s2129_s7, %s1451_s18 }
  0x47   : > { %v363_v16 = vsub.f32 1.0, %v362_v15  ;;  %639 = vmatpush.bf16.msra.mxu3 %v1301_v35  ;;  %v1257_v51 = vor.u32 %v1472_v49, %v1256_v48  ;;  %v1258_v52 = vld [vmem:[#allocation7 + $0x90] sm:$0xf0]  ;;  %v1264_v53 = vld [vmem:[#allocation7 + $0x88] sm:$0xf]  ;;  %s357_s10 = scalar_lea.vmem [#allocation11], %s1184_s11 }
  0x48   : > { %v1473_v54 = vld [vmem:[#allocation7 + $0x94] sm:$0xf0]  ;;  %v1261_v55 = vor.u32 %v1470_v50, %v1258_v52  ;;  %v1471_v57 = vld [vmem:[#allocation7 + $0x8c] sm:$0xf]  ;;  %v1266_v58 = vld [vmem:[#allocation7 + $0x98] sm:$0xf0] }
  0x49   : > { %v364_v17 = vmul.f32 %v1614_v14, %v363_v16  ;;  %601 = vmatpush.bf16.msra.mxu0 %v1273_v39  ;;  %614 = vmatpush.bf16.msra.mxu1 %v1277_v43  ;;  %v1265_v56 = vor.u32 %v1473_v54, %v1264_v53  ;;  %v1269_v59 = vor.u32 %v1471_v57, %v1266_v58  ;;  %v1240_v60 = vld [vmem:[#allocation7 + $0x60] sm:$0xf]  ;;  %v1468_v61 = vld [vmem:[#allocation7 + $0x6c] sm:$0xf0]  ;;  %v1466_v62 = vld [vmem:[#allocation7 + $0x64] sm:$0xf] }
  0x4a   : > { %627 = vmatpush.bf16.msra.mxu2 %v1281_v44  ;;  %v1241_v63 = vor.u32 %v1468_v61, %v1240_v60  ;;  %v1242_v1 = vld [vmem:[#allocation7 + $0x70] sm:$0xf0]  ;;  %v1248_v2 = vld [vmem:[#allocation7 + $0x68] sm:$0xf]  ;;  %v1469_v3 = vld [vmem:[#allocation7 + $0x74] sm:$0xf0] }
  0x4b   : > { %v365_v18 = vadd.f32 %v1614_v14, %v364_v17  ;;  %640 = vmatpush.bf16.msra.mxu3 %v1285_v47  ;;  %v1245_v4 = vor.u32 %v1466_v62, %v1242_v1  ;;  %v1249_v5 = vor.u32 %v1469_v3, %v1248_v2  ;;  %v1467_v6 = vld [vmem:[#allocation7 + $0x6c] sm:$0xf]  ;;  %v1250_v7 = vld [vmem:[#allocation7 + $0x78] sm:$0xf0]  ;;  %v1224_v9 = vld [vmem:[#allocation7 + $0x40] sm:$0xf] }
  0x4c   : > { %v1253_v8 = vor.u32 %v1467_v6, %v1250_v7  ;;  %v1464_v10 = vld [vmem:[#allocation7 + $0x4c] sm:$0xf0]  ;;  %v1462_v11 = vld [vmem:[#allocation7 + $0x44] sm:$0xf]  ;;  %v1226_v13 = vld [vmem:[#allocation7 + $0x50] sm:$0xf0] }
  0x4d   : > { %v2047_v19 = vsel %vm366_vm0, %v1614_v14, %v365_v18  ;;  %602 = vmatpush.bf16.msra.mxu0 %v1257_v51  ;;  %615 = vmatpush.bf16.msra.mxu1 %v1261_v55  ;;  %v1225_v12 = vor.u32 %v1464_v10, %v1224_v9  ;;  %v1232_v14 = vld [vmem:[#allocation7 + $0x48] sm:$0xf]  ;;  %v1465_v15 = vld [vmem:[#allocation7 + $0x54] sm:$0xf0]  ;;  %v1229_v16 = vor.u32 %v1462_v11, %v1226_v13  ;;  %v1463_v18 = vld [vmem:[#allocation7 + $0x4c] sm:$0xf] }
  0x4e   : > { %628 = vmatpush.bf16.msra.mxu2 %v1265_v56  ;;  %v1233_v17 = vor.u32 %v1465_v15, %v1232_v14  ;;  %v1460_v24 = vld [vmem:[#allocation7 + $0x2c] sm:$0xf0]  ;;  %v1458_v25 = vld [vmem:[#allocation7 + $0x24] sm:$0xf]  ;;  %v1210_v27 = vld [vmem:[#allocation7 + $0x30] sm:$0xf0] }
  0x4f   : > { %641 = vmatpush.bf16.msra.mxu3 %v1269_v59  ;;  %v1216_v28 = vld [vmem:[#allocation7 + $0x28] sm:$0xf]  ;;  %v1461_v29 = vld [vmem:[#allocation7 + $0x34] sm:$0xf0]  ;;  %v1213_v30 = vor.u32 %v1458_v25, %v1210_v27  ;;  %v1459_v32 = vld [vmem:[#allocation7 + $0x2c] sm:$0xf] }
  0x50   : > { %v1217_v31 = vor.u32 %v1461_v29, %v1216_v28  ;;  %v1218_v33 = vld [vmem:[#allocation7 + $0x38] sm:$0xf0]  ;;  %v1192_v34 = vld [vmem:[#allocation7] sm:$0xf]  ;;  %v1456_v36 = vld [vmem:[#allocation7 + $0xc] sm:$0xf0] }
  0x51   : > { %603 = vmatpush.bf16.msra.mxu0 %v1241_v63  ;;  %616 = vmatpush.bf16.msra.mxu1 %v1245_v4  ;;  %v1221_v35 = vor.u32 %v1459_v32, %v1218_v33  ;;  %v1454_v37 = vld [vmem:[#allocation7 + $0x4] sm:$0xf]  ;;  %v1194_v38 = vld [vmem:[#allocation7 + $0x10] sm:$0xf0]  ;;  %v1193_v39 = vor.u32 %v1456_v36, %v1192_v34  ;;  %v1200_v41 = vld [vmem:[#allocation7 + $0x8] sm:$0xf] }
  0x52   : > { %629 = vmatpush.bf16.msra.mxu2 %v1249_v5  ;;  %v1197_v40 = vor.u32 %v1454_v37, %v1194_v38  ;;  %v1457_v42 = vld [vmem:[#allocation7 + $0x14] sm:$0xf0]  ;;  %v1455_v43 = vld [vmem:[#allocation7 + $0xc] sm:$0xf]  ;;  %v1202_v45 = vld [vmem:[#allocation7 + $0x18] sm:$0xf0] }
  0x53   : > { %642 = vmatpush.bf16.msra.mxu3 %v1253_v8  ;;  %v1201_v44 = vor.u32 %v1457_v42, %v1200_v41  ;;  %v1205_v46 = vor.u32 %v1455_v43, %v1202_v45  ;;  %v1610_v56 = vld [vmem:[#allocation5] ss:$0 sm:$0xff]  ;;  %v1611_v59 = vld [vmem:[%s2124_s2] ss:$0 sm:$0xff]  ;;  %v1492_v1 = vld [vmem:[#allocation10 + $0x30] sm:$0xff]  ;;  %s1063_s12 = sshll.u32 %s357_s10, 4  ;;  %s1064_s12 = int_to_ptr.vmem [resolvable:$true] %s1063_s12 }
  0x54   : > { %v1493_v62 = vld [vmem:[#allocation10 + $0x38] sm:$0xff]  ;;  %v1500_v2 = vld [vmem:[#allocation10 + $0x70] sm:$0xff]  ;;  %v1491_v4 = vld [vmem:[#allocation10 + $0x28] sm:$0xff]  ;;  %s1065_s30 = sshll.u32 %s1061_s29, 4  ;;  %s1051_s8 = scalar_lea.sflag [#allocation4], %s2026_s22  ;;  %s1066_s30 = int_to_ptr.hbm [resolvable:$true] %s1065_s30 }
  0x55   : > { %604 = vmatpush.bf16.msra.mxu0 %v1225_v12  ;;  %617 = vmatpush.bf16.msra.mxu1 %v1229_v16  ;;  %v1501_v63 = vld [vmem:[#allocation10 + $0x78] sm:$0xff]  ;;  %v1499_v5 = vld [vmem:[#allocation10 + $0x68] sm:$0xff]  ;;  %v1508_v6 = vld [vmem:[#allocation10 + $0xb0] sm:$0xff]  ;;  %s1797_s21 = sshra.s32 %s1066_s30, 4  ;;  %s1803_s3 = scalar_lea.hbm %s2129_s7, 16  ;;  %s1798_s21 = int_to_ptr.hbm [resolvable:$true] %s1797_s21 }
  0x56   : > { %630 = vmatpush.bf16.msra.mxu2 %v1233_v17  ;;  %v1517_v3 = vld [vmem:[#allocation10 + $0xf8] sm:$0xff]  ;;  %v1516_v7 = vld [vmem:[#allocation10 + $0xf0] sm:$0xff]  ;;  %v1490_v8 = vld [vmem:[#allocation10 + $0x20] sm:$0xff]  ;;  %s1799_s13 = scalar_lea.hbm %s1798_s21, 8  ;;  %p1804_p12 = scmp.lt.s32.totalorder %s1798_s21, %s2129_s7 }
  0x57   : > { %v1498_v9 = vld [vmem:[#allocation10 + $0x60] sm:$0xff]  ;;  %v1507_v10 = vld [vmem:[#allocation10 + $0xa8] sm:$0xff]  ;;  %v1489_v12 = vld [vmem:[#allocation10 + $0x18] sm:$0xff]  ;;  %p1800_p1 = scmp.ne.s32.totalorder %s1798_s21, %s1799_s13  ;;  %p1805_p7 = scmp.lt.s32.totalorder %s1803_s3, %s1799_s13 }
  0x58   : > { %v1515_v11 = vld [vmem:[#allocation10 + $0xe8] sm:$0xff]  ;;  %v1497_v13 = vld [vmem:[#allocation10 + $0x58] sm:$0xff]  ;;  %v1506_v14 = vld [vmem:[#allocation10 + $0xa0] sm:$0xff] }
  0x59   : > { %618 = vmatpush.bf16.msra.mxu1 %v1213_v30  ;;  %v1514_v15 = vld [vmem:[#allocation10 + $0xe0] sm:$0xff]  ;;  %v429_v16 = vld [vmem:[#allocation8] sm:$0xf]  ;;  %v1488_v17 = vld [vmem:[#allocation10 + $0x10] sm:$0xff]  ;;  %p1801_p3 = pnand %p1800_p1, %p1995_p5  ;;  %p1806_p8 = por %p1805_p7, %p1804_p12 }
  0x5a   : > { %631 = vmatpush.bf16.msra.mxu2 %v1217_v31  ;;  %v1487_v25 = vld [vmem:[#allocation10 + $0x8] sm:$0xff]  ;;  %v1504_v29 = vld [vmem:[#allocation10 + $0x90] sm:$0xff]  ;;  %v1486_v33 = vld [vmem:[#allocation10] sm:$0xff]  ;;  %v433_v37 = vperm.slane %v429_v16, 2  ;;  %v434_v38 = vperm.slane %v429_v16, 3 }
  0x5b   : > { %v1512_v30 = vld [vmem:[#allocation10 + $0xd0] sm:$0xff]  ;;  %v1494_v34 = vld [vmem:[#allocation10 + $0x40] sm:$0xff]  ;;  %p1802_p4 = pneg %p1801_p3 }
  0x5d   : > { %619 = vmatpush.bf16.msra.mxu1 %v1197_v40  ;;  %v1511_v40 = vld [vmem:[#allocation10 + $0xc8] sm:$0xff]  ;;  %p1807_p9 = pnand %p1806_p8, %p1802_p4 }
  0x5e   : > { %632 = vmatpush.bf16.msra.mxu2 %v1201_v44 }
  0x61   : > { %1008 = vmatpush.bf16.msrb.mxu1 %v1501_v63 }
  0x65   : > { %1009 = vmatpush.bf16.msrb.mxu1 %v1500_v2 }
  0x69   : > { %1010 = vmatpush.bf16.msrb.mxu1 %v1499_v5 }
  0x6d   : > { %1011 = vmatpush.bf16.msrb.mxu1 %v1498_v9 }
  0x71   : > { %1012 = vmatpush.bf16.msrb.mxu1 %v1497_v13 }
  0xb1   : > { %v360_v20 = vpop.xlane.xlu0 %359 }
  0xb2   : > { %v368_v21 = vmul.f32 %v2047_v19, %v360_v20  ;;  %v1234_v20 = vld [vmem:[#allocation7 + $0x58] sm:$0xf0] }
  0xb4   : > { %v2051_v22 = vsub.f32 %v2044_v0, %v368_v21  ;;  %v1237_v21 = vor.u32 %v1463_v18, %v1234_v20  ;;  %v1496_v18 = vld [vmem:[#allocation10 + $0x50] sm:$0xff]  ;;  %v1505_v20 = vld [vmem:[#allocation10 + $0x98] sm:$0xff] }
  0xb5   : > { %1013 = vmatpush.bf16.msrb.mxu1 %v1496_v18 }
  0xb6   : > { %v370_v23 = vmul.f32 %v2051_v22, %v2051_v22  ;;  %643 = vmatpush.bf16.msra.mxu3 %v1237_v21  ;;  %v1513_v21 = vld [vmem:[#allocation10 + $0xd8] sm:$0xff] }
  0xb8   : > { %371 = vadd.xlane.f32.xlu0 %v370_v23  ;;  %v1208_v23 = vld [vmem:[#allocation7 + $0x20] sm:$0xf] }
  0xb9   : > { %v1209_v26 = vor.u32 %v1460_v24, %v1208_v23  ;;  %v431_v23 = vperm.slane %v429_v16, 0  ;;  %v432_v24 = vperm.slane %v429_v16, 1 }
  0xba   : > { %644 = vmatpush.bf16.msra.mxu3 %v1221_v35 }
  0xbb   : > { %605 = vmatpush.bf16.msra.mxu0 %v1209_v26  ;;  %v1495_v26 = vld [vmem:[#allocation10 + $0x48] sm:$0xff] }
  0xbc   : > { %1014 = vmatpush.bf16.msrb.mxu1 %v1495_v26 }
  0xbe   : > { %645 = vmatpush.bf16.msra.mxu3 %v1205_v46 }
  0xbf   : > { %606 = vmatpush.bf16.msra.mxu0 %v1193_v39  ;;  %v1503_v39 = vld [vmem:[#allocation10 + $0x88] sm:$0xff] }
  0xc0   : > { %1015 = vmatpush.bf16.msrb.mxu1 %v1494_v34 }
  0xc2   : > { %1034 = vmatpush.bf16.msrb.mxu3 %v1517_v3 }
  0xc3   : > { %995 = vmatpush.bf16.msrb.mxu0 %v1493_v62 }
  0xc6   : > { %1035 = vmatpush.bf16.msrb.mxu3 %v1516_v7 }
  0xc7   : > { %996 = vmatpush.bf16.msrb.mxu0 %v1492_v1 }
  0xca   : > { %1036 = vmatpush.bf16.msrb.mxu3 %v1515_v11 }
  0xcb   : > { %997 = vmatpush.bf16.msrb.mxu0 %v1491_v4 }
  0xce   : > { %1037 = vmatpush.bf16.msrb.mxu3 %v1514_v15 }
  0xcf   : > { %998 = vmatpush.bf16.msrb.mxu0 %v1490_v8 }
  0xd2   : > { %1038 = vmatpush.bf16.msrb.mxu3 %v1513_v21 }
  0xd3   : > { %999 = vmatpush.bf16.msrb.mxu0 %v1489_v12 }
  0xd6   : > { %1039 = vmatpush.bf16.msrb.mxu3 %v1512_v30 }
  0xd7   : > { %1000 = vmatpush.bf16.msrb.mxu0 %v1488_v17 }
  0xda   : > { %1040 = vmatpush.bf16.msrb.mxu3 %v1511_v40 }
  0xdb   : > { %1001 = vmatpush.bf16.msrb.mxu0 %v1487_v25 }
  0xdf   : > { %1002 = vmatpush.bf16.msrb.mxu0 %v1486_v33 }
 0x12b   : > { %v372_v47 = vpop.xlane.xlu0 %371 }
 0x12c   : > { %v373_v48 = vmul.f32 %v372_v47, %v2047_v19  ;;  %v1502_v47 = vld [vmem:[#allocation10 + $0x80] sm:$0xff] }
 0x12e   : > { %v374_v49 = vadd.f32 1e-05, %v373_v48  ;;  %v1510_v48 = vld [vmem:[#allocation10 + $0xc0] sm:$0xff] }
 0x12f   : > { %1041 = vmatpush.bf16.msrb.mxu3 %v1510_v48 }
 0x130   : > { %1615 = vrsqrt.f32 %v374_v49  ;;  %vm381_vm2 = vweird.f32 %v374_v49 }
 0x136   : > { %v1616_v50 = vpop.eup %1615 }
 0x137   : > { %v376_v51 = vmul.f32 %v1616_v50, %v374_v49  ;;  %vm382_vm1 = vweird.f32 %v1616_v50 }
 0x138   : > { %vm383_vm3 = vmor %vm381_vm2, %vm382_vm1 }
 0x139   : > { %v377_v52 = vmul.f32 %v1616_v50, %v376_v51 }
 0x13b   : > { %v378_v53 = vmul.f32 0.5, %v377_v52 }
 0x13d   : > { %v379_v54 = vsub.f32 1.5, %v378_v53 }
 0x13f   : > { %v380_v55 = vmul.f32 %v1616_v50, %v379_v54 }
 0x141   : > { %v384_v57 = vsel %vm383_vm3, %v1616_v50, %v380_v55 }
 0x142   : > { %v385_v58 = vmul.f32 %v384_v57, %v2051_v22  ;;  %v1509_v22 = vld [vmem:[#allocation10 + $0xb8] sm:$0xff] }
 0x143   : > { %1021 = vmatpush.bf16.msrb.mxu2 %v1509_v22 }
 0x144   : > { %v390_v19 = vmul.f32 %v1610_v56, %v385_v58 }
 0x146   : > { %v395_v60 = vadd.f32 %v1611_v59, %v390_v19 }
 0x147   : > { %1022 = vmatpush.bf16.msrb.mxu2 %v1508_v6 }
 0x148   : > { %v396_v61 = vpack.c.bf16 %v395_v60, %v395_v60 }
 0x14a   : > { %607 = vmatmul.bf16.vlgmr.msra.gmra.mxu0 %v396_v61  ;;  %620 = vmatmul.bf16.vlgmr.msra.gmra.mxu1 %v396_v61 }
 0x14b   : > { %633 = vmatmul.bf16.vlgmr.msra.gmra.mxu2 %v396_v61  ;;  %646 = vmatmul.bf16.vlgmr.msra.gmra.mxu3 %v396_v61 }
 0x14c   : > { %1023 = vmatpush.bf16.msrb.mxu2 %v1507_v10 }
 0x150   : > { %1024 = vmatpush.bf16.msrb.mxu2 %v1506_v14 }
 0x154   : > { %1025 = vmatpush.bf16.msrb.mxu2 %v1505_v20 }
 0x158   : > { %1026 = vmatpush.bf16.msrb.mxu2 %v1504_v29 }
 0x15c   : > { %1027 = vmatpush.bf16.msrb.mxu2 %v1503_v39 }
 0x160   : > { %1028 = vmatpush.bf16.msrb.mxu2 %v1502_v47 }
 0x1c7   : > { %v608_v27 = vpop.f32.mrf.mxu0  ;;  %v621_v28 = vpop.f32.mrf.mxu1 }
 0x1c8   : > { %v2060_v31 = vadd.f32 %v608_v27, %v431_v23  ;;  %v2062_v32 = vadd.f32 %v621_v28, %v432_v24 }
 0x1ca   : > { %v1318_v35 = vmul.f32 -1.442695, %v2060_v31  ;;  %v1319_v36 = vmul.f32 -1.442695, %v2062_v32 }
 0x1cc   : > { %1617 = vpow2.f32 %v1318_v35 }
 0x1cd   : > { %1619 = vpow2.f32 %v1319_v36 }
 0x1ce   : > { %v634_v41 = vpop.f32.mrf.mxu2  ;;  %v647_v42 = vpop.f32.mrf.mxu3 }
 0x1cf   : > { %v2066_v43 = vadd.f32 %v634_v41, %v433_v37  ;;  %v2068_v44 = vadd.f32 %v647_v42, %v434_v38  ;;  %v610_v45 = vpop.f32.mrf.mxu0  ;;  %v623_v46 = vpop.f32.mrf.mxu1 }
 0x1d1   : > { %v1320_v49 = vmul.f32 -1.442695, %v2066_v43  ;;  %v1321_v50 = vmul.f32 -1.442695, %v2068_v44 }
 0x1d2   : > { %v1618_v51 = vpop.eup %1617 }
 0x1d3   : > { %v1620_v52 = vpop.eup %1619  ;;  %v663_v53 = vadd.f32 1.0, %v1618_v51  ;;  %1621 = vpow2.f32 %v1320_v49 }
 0x1d4   : > { %v664_v54 = vadd.f32 1.0, %v1620_v52  ;;  %1623 = vpow2.f32 %v1321_v50  ;;  %v1612_v50 = vld [vmem:[%s2128_s6] ss:$0 sm:$0xff] }
 0x1d5   : > { %1625 = vrcp.f32 %v663_v53  ;;  %v676_v2 = vand.u32 2147483647, %v663_v53  ;;  %v678_v22 = vand.u32 2147483648, %v663_v53  ;;  %vm672_vm6 = vweird.f32 %v663_v53 }
 0x1d6   : > { %1627 = vrcp.f32 %v664_v54  ;;  %v636_v55 = vpop.f32.mrf.mxu2  ;;  %v649_v56 = vpop.f32.mrf.mxu3  ;;  %v691_v5 = vand.u32 2147483647, %v664_v54  ;;  %v693_v6 = vand.u32 2147483648, %v664_v54  ;;  %vm687_vm8 = vweird.f32 %v664_v54 }
 0x1d7   : > { %v679_v10 = vor.u32 1.1754944e-38, %v678_v22  ;;  %vm677_vm9 = vcmp.eq.f32.partialorder %v676_v2, 8.507059e+37 }
 0x1d8   : > { %vm692_vm11 = vcmp.eq.f32.partialorder %v691_v5, 8.507059e+37  ;;  %v694_v15 = vor.u32 1.1754944e-38, %v693_v6 }
 0x1d9   : > { %v1622_v57 = vpop.eup %1621 }
 0x1da   : > { %v1624_v58 = vpop.eup %1623  ;;  %v665_v59 = vadd.f32 1.0, %v1622_v57 }
 0x1db   : > { %v1626_v19 = vpop.eup %1625  ;;  %v2072_v60 = vadd.f32 1.0, %v1624_v58 }
 0x1dc   : > { %v1628_v61 = vpop.eup %1627  ;;  %v668_v62 = vmul.f32 %v1626_v19, %v663_v53  ;;  %1629 = vrcp.f32 %v665_v59  ;;  %vm673_vm4 = vweird.f32 %v1626_v19  ;;  %v706_v24 = vand.u32 2147483647, %v665_v59 }
 0x1dd   : > { %v683_v63 = vmul.f32 %v1628_v61, %v664_v54  ;;  %1631 = vrcp.f32 %v2072_v60  ;;  %vm688_vm5 = vweird.f32 %v1628_v61  ;;  %vm674_vm7 = vmor %vm672_vm6, %vm673_vm4  ;;  %v708_v25 = vand.u32 2147483648, %v665_v59 }
 0x1de   : > { %v669_v1 = vsub.f32 1.0, %v668_v62  ;;  %vm689_vm10 = vmor %vm687_vm8, %vm688_vm5  ;;  %vm702_vm13 = vweird.f32 %v665_v59  ;;  %v721_v30 = vand.u32 2147483647, %v2072_v60  ;;  %v723_v33 = vand.u32 2147483648, %v2072_v60 }
 0x1df   : > { %v684_v3 = vsub.f32 1.0, %v683_v63  ;;  %vm707_vm0 = vcmp.eq.f32.partialorder %v706_v24, 8.507059e+37  ;;  %vm717_vm1 = vweird.f32 %v2072_v60 }
 0x1e0   : > { %v670_v4 = vmul.f32 %v1626_v19, %v669_v1  ;;  %v724_v39 = vor.u32 1.1754944e-38, %v723_v33  ;;  %vm722_vm3 = vcmp.eq.f32.partialorder %v721_v30, 8.507059e+37 }
 0x1e1   : > { %v685_v7 = vmul.f32 %v1628_v61, %v684_v3 }
 0x1e2   : > { %v1630_v8 = vpop.eup %1629  ;;  %v671_v9 = vadd.f32 %v1626_v19, %v670_v4 }
 0x1e3   : > { %v686_v11 = vadd.f32 %v1628_v61, %v685_v7  ;;  %v698_v12 = vmul.f32 %v1630_v8, %v665_v59  ;;  %v1632_v13 = vpop.eup %1631  ;;  %vm703_vm12 = vweird.f32 %v1630_v8 }
 0x1e4   : > { %v675_v14 = vsel %vm674_vm7, %v1626_v19, %v671_v9  ;;  %v713_v20 = vmul.f32 %v1632_v13, %v2072_v60  ;;  %vm718_vm14 = vweird.f32 %v1632_v13  ;;  %vm704_vm15 = vmor %vm702_vm13, %vm703_vm12 }
 0x1e5   : > { %v680_v16 = vsel %vm677_vm9, %v679_v10, %v675_v14  ;;  %v690_v17 = vsel %vm689_vm10, %v1628_v61, %v686_v11  ;;  %v699_v18 = vsub.f32 1.0, %v698_v12  ;;  %vm719_vm2 = vmor %vm717_vm1, %vm718_vm14 }
 0x1e6   : > { %v727_v21 = vmul.f32 %v680_v16, %v2060_v31  ;;  %v695_v23 = vsel %vm692_vm11, %v694_v15, %v690_v17  ;;  %v714_v28 = vsub.f32 1.0, %v713_v20  ;;  %v709_v31 = vor.u32 1.1754944e-38, %v708_v25 }
 0x1e7   : > { %v728_v26 = vmul.f32 %v695_v23, %v2062_v32  ;;  %v700_v27 = vmul.f32 %v1630_v8, %v699_v18 }
 0x1e8   : > { %v731_v29 = vpack.c.bf16 %v727_v21, %v727_v21  ;;  %v715_v36 = vmul.f32 %v1632_v13, %v714_v28 }
 0x1e9   : > { %v732_v34 = vpack.c.bf16 %v728_v26, %v728_v26  ;;  %v701_v35 = vadd.f32 %v1630_v8, %v700_v27 }
 0x1ea   : > { %1003 = vmatmul.bf16.vlgmr.msrb.gmra.mxu0 %v731_v29  ;;  %v716_v38 = vadd.f32 %v1632_v13, %v715_v36 }
 0x1eb   : > { %v705_v37 = vsel %vm704_vm15, %v1630_v8, %v701_v35  ;;  %1016 = vmatmul.bf16.vlgmr.msrb.gmra.mxu1 %v732_v34 }
 0x1ec   : > { %v710_v32 = vsel %vm707_vm0, %v709_v31, %v705_v37  ;;  %v720_v41 = vsel %vm719_vm2, %v1632_v13, %v716_v38 }
 0x1ed   : > { %v729_v40 = vmul.f32 %v710_v32, %v2066_v43  ;;  %v725_v42 = vsel %vm722_vm3, %v724_v39, %v720_v41 }
 0x1ee   : > { %v730_v46 = vmul.f32 %v725_v42, %v2068_v44 }
 0x1ef   : > { %v733_v45 = vpack.c.bf16 %v729_v40, %v729_v40 }
 0x1f0   : > { %v734_v47 = vpack.c.bf16 %v730_v46, %v730_v46 }
 0x1f1   : > { %1029 = vmatmul.bf16.vlgmr.msrb.gmra.mxu2 %v733_v45 }
 0x1f2   : > { %1042 = vmatmul.bf16.vlgmr.msrb.gmra.mxu3 %v734_v47 }
 0x267   : > { %v1004_v48 = vpop.f32.mrf.mxu0 }
 0x268   : > { %v1017_v49 = vpop.f32.mrf.mxu1  ;;  %v1005_v51 = vadd.f32 %v1612_v50, %v1004_v48 }
 0x26a   : > { %v1018_v43 = vadd.f32 %v1017_v49, %v1005_v51 }
 0x26f   : > { %v1006_v52 = vpop.f32.mrf.mxu0 }
 0x270   : > { %v1019_v53 = vpop.f32.mrf.mxu1 }
 0x274   : > { %v1030_v54 = vpop.f32.mrf.mxu2 }
 0x275   : > { %v1031_v55 = vadd.f32 %v1030_v54, %v1018_v43  ;;  %v1043_v44 = vpop.f32.mrf.mxu3 }
 0x277   : > { %v1044_v56 = vadd.f32 %v1043_v44, %v1031_v55 }
 0x279   : > { %v1047_v57 = vmul.f32 0.5, %v1044_v56 }
 0x27b   : > { %v1048_v58 = vadd.f32 %v1047_v57, %v2044_v0 }
 0x27c   : > { %v1032_v59 = vpop.f32.mrf.mxu2 }
 0x27d   : > { %1049 = vst [vmem:[%s357_s10] sm:$0xff] %v1048_v58  ;;  %v1045_v19 = vpop.f32.mrf.mxu3 }
 0x27e   : > { %1810 = shalt.err (!%p1807_p9)
}
 0x27f   : > { %1536 = dma.vmem_to_hbm [thread:$0]  (%p1995_p5), %s1064_s12, 128, %s1066_s30, %s1051_s8  }
 0x280 PF: > { %s1077_s22 = sand.u32 1, %s1845_s24   ;;  %p2141_p10 = scmp.ge.s32.totalorder %s1857_s27, 2 }
 0x281   : > { %s1078_s14 = scalar_lea.sflag [#allocation4], %s1077_s22 }
 0x282   : > { %p1556_p13 = pnand %p2141_p10, %p1999_p6 }
 0x284   : > { %p1557_p11 = pneg %p1556_p13 }
 0x286   : > { %1840 = dma.done.wait (%p1557_p11), %s1078_s14, 128  }
 0x287   : > { %1842 = vsyncadd (%p1557_p11), %s1078_s14, 4294967168  ;;  %p22_p0 = scmp.ge.s32.totalorder %s1969_s17, 4   ;;  %s2142_s24 = smov %s1849_s25 }
 0x288   : > { %s2143_s25 = smov %s1853_s26  ;;  %s2144_s26 = smov %s1980_s20 }
 0x289   : > { %s2145_s27 = smov %s1969_s17  ;;  %24 = sbr.rel (!%p22_p0) target bundleno = 10 (0xa), region = 109 }
 0x28e   :  { %1084 = vsyncpa [#allocation3], 1 }
 0x28f   :  { %1086 = vsyncpa [#allocation3 + $0x1], 1 }
 0x290   :  { %1087 = vsyncpa [#allocation6], 1 }
 0x291   :  { %1088 = vsyncpa [#allocation9], 1 }
 0x292   :  { %1089 = vsyncpa [#allocation4], 1 }
 0x293   :  { %1091 = vsyncpa [#allocation4 + $0x1], 1 }

</bundles_post_ra>
